<compile_context>
chip_gen: v6e
topology: v6e:2x2x1
jax: 0.10.0
libtpu: 0.0.40
codegen_flags: <defaults>
</compile_context>

<pallas_src>
import functools

import jax
import jax.numpy as jnp
from jax import lax
from jax.experimental import pallas as pl
from jax.experimental.pallas import tpu as pltpu


# ---------------------------------------------------------------------------
# Kernels
# ---------------------------------------------------------------------------

def _kernel_spatial_lanes(*refs, relu, has_res):
    """out[co, hw] = act(W @ x + b (+ res)); spatial dim on the lane axis."""
    if has_res:
        x_ref, w_ref, b_ref, r_ref, o_ref = refs
    else:
        x_ref, w_ref, b_ref, o_ref = refs
        r_ref = None
    acc = jnp.dot(w_ref[...], x_ref[...], preferred_element_type=jnp.float32)
    acc = acc + b_ref[...]                              # (C_out, 1) broadcast
    if r_ref is not None:
        acc = acc + r_ref[...].astype(jnp.float32)
    if relu:
        acc = jnp.maximum(acc, 0.0)
    o_ref[...] = acc.astype(o_ref.dtype)


def _kernel_channel_lanes(*refs, relu, has_res):
    """out[hw, co] = act(x^T @ W^T + b (+ res^T)); channels on the lane axis."""
    if has_res:
        x_ref, wt_ref, b_ref, r_ref, o_ref = refs
    else:
        x_ref, wt_ref, b_ref, o_ref = refs
        r_ref = None
    # x_ref: (C_in, HW), wt_ref: (C_in, t_co) -> contract over C_in (dim 0, 0).
    acc = lax.dot_general(x_ref[...], wt_ref[...],
                          dimension_numbers=(((0,), (0,)), ((), ())),
                          preferred_element_type=jnp.float32)   # (HW, t_co)
    acc = acc + b_ref[...]                              # (1, t_co) broadcast
    if r_ref is not None:
        # Residual arrives in NCHW order; small in-VMEM (XLU) transpose.
        acc = acc + r_ref[...].T.astype(jnp.float32)    # (t_co, HW) -> (HW, t_co)
    if relu:
        acc = jnp.maximum(acc, 0.0)
    o_ref[...] = acc.astype(o_ref.dtype)


# ---------------------------------------------------------------------------
# Weight / residual preparation helpers (host / plain-JAX side)
# ---------------------------------------------------------------------------

def fold_batchnorm(weight, gamma, beta, running_mean, running_var, eps=1e-5,
                   conv_bias=None):
    """Fold an inference-mode BatchNorm into the preceding 1x1 conv weights."""
    w = weight.reshape(weight.shape[0], -1)             # (C_out, C_in[,1,1]) -> 2D
    scale = gamma / jnp.sqrt(running_var + eps)
    w_folded = w * scale[:, None]
    b_folded = beta - running_mean * scale
    if conv_bias is not None:
        b_folded = b_folded + conv_bias * scale
    return w_folded, b_folded


def index_add_identity(identity_nchw, indices, c_out):
    """Mimics torch `out.index_add_(1, indices, identity)`: maps the identity's
    channels into the out-channel space so it can be fused as a plain residual.
    TODO(synk): fuse this channel scatter into the kernel instead of a pre-pass."""
    n, c_id, h, w = identity_nchw.shape
    if indices is None:
        assert c_id == c_out
        return identity_nchw
    base = jnp.zeros((n, c_out, h, w), identity_nchw.dtype)
    return base.at[:, indices, :, :].add(identity_nchw)


def _choose_tile_hw(hw, ch_per_col, itemsize, cap, budget_bytes=20 * (1 << 20)):
    """Largest lane-dense spatial tile whose double-buffered blocks fit budget."""
    if hw <= cap and 2 * hw * ch_per_col * itemsize <= budget_bytes:
        return hw                                        # one full-extent block
    t = budget_bytes // (2 * ch_per_col * itemsize)
    t = max(128, (min(int(t), cap) // 128) * 128)        # multiple of 128 lanes
    return hw if t >= hw else t


# ---------------------------------------------------------------------------
# Fused conv1x1 (+folded BN) + residual + ReLU wrapper
# ---------------------------------------------------------------------------

@functools.partial(
    jax.jit,
    static_argnames=("relu", "stride", "compute_dtype", "out_dtype",
                     "tile_hw_cap", "hw_small_threshold"))
def conv1x1_bn_act(x_nchw, weight, bias=None, residual=None, *, relu=False,
                   stride=1, compute_dtype=None, out_dtype=None,
                   tile_hw_cap=None, hw_small_threshold=256):
    """Fused 1x1 Conv2d (+ folded BN) + optional residual add + optional ReLU.

    x_nchw:   (N, C_in, H, W)
    weight:   (C_out, C_in) or (C_out, C_in, 1, 1); BN already folded in.
    bias:     (C_out,) or None (folded BN shift).
    residual: (N, C_out, H_out, W_out) or None; identity already mapped to the
              out-channel space (see index_add_identity), added before ReLU.
    Returns NCHW (N, C_out, H_out, W_out).
    """
    if weight.ndim == 4:
        weight = weight.reshape(weight.shape[0], weight.shape[1])
    c_out, c_in = weight.shape

    if stride > 1:
        # 1x1 conv with stride == spatial subsampling followed by a 1x1 conv.
        x_nchw = x_nchw[:, :, ::stride, ::stride]
    n, c_in_x, h, w = x_nchw.shape
    assert c_in_x == c_in
    hw = h * w

    in_dtype = jnp.dtype(x_nchw.dtype)
    cdt = jnp.dtype(compute_dtype) if compute_dtype is not None else in_dtype
    odt = jnp.dtype(out_dtype) if out_dtype is not None else in_dtype

    if bias is None:
        bias = jnp.zeros((c_out,), jnp.float32)
    bias = bias.astype(jnp.float32)                      # added on the f32 acc

    # Free reshape: stays in NCHW memory order, spatial becomes the last dim.
    x3 = x_nchw.reshape(n, c_in, hw).astype(cdt)
    wm = weight.astype(cdt)
    res3 = None
    if residual is not None:
        assert residual.shape == (n, c_out, h, w)
        res3 = residual.reshape(n, c_out, hw).astype(cdt)
    has_res = res3 is not None

    isz, osz = cdt.itemsize, odt.itemsize
    flops = 2 * n * c_out * c_in * hw
    bytes_accessed = (n * c_in * hw * isz + c_out * c_in * isz + 4 * c_out
                      + n * c_out * hw * osz
                      + (n * c_out * hw * isz if has_res else 0))

    # Deep-stage layers (HW = 196 / 49) defeat spatial-on-lanes; put the big
    # channel dim on the lane axis instead when it is lane-dense.
    use_channel_lanes = (hw < hw_small_threshold) and (c_out % 128 == 0)

    if not use_channel_lanes:
        # ----- Variant A: spatial on lanes, output stays NCHW --------------
        cap = tile_hw_cap if tile_hw_cap is not None else (8192 if isz <= 2 else 4096)
        ch_per_col = c_in + c_out + (c_out if has_res else 0)
        t_hw = _choose_tile_hw(hw, ch_per_col, max(isz, osz), cap)
        grid = (n, pl.cdiv(hw, t_hw))

        in_specs = [
            pl.BlockSpec((None, c_in, t_hw), lambda i, j: (i, 0, j)),
            # Constant-index weight / bias: single buffer is enough.
            pl.BlockSpec((c_out, c_in), lambda i, j: (0, 0),
                         pipeline_mode=pl.Buffered(1)),
            pl.BlockSpec((c_out, 1), lambda i, j: (0, 0),
                         pipeline_mode=pl.Buffered(1)),
        ]
        args = [x3, wm, bias.reshape(c_out, 1)]
        if has_res:
            in_specs.append(pl.BlockSpec((None, c_out, t_hw),
                                         lambda i, j: (i, 0, j)))
            args.append(res3)

        vmem_est = (2 * t_hw * (c_in * isz + c_out * osz
                                + (c_out * isz if has_res else 0))
                    + c_out * c_in * isz + c_out * 128 * 4)
        out3 = pl.pallas_call(
            functools.partial(_kernel_spatial_lanes, relu=relu, has_res=has_res),
            out_shape=jax.ShapeDtypeStruct((n, c_out, hw), odt),
            grid_spec=pltpu.PrefetchScalarGridSpec(
                num_scalar_prefetch=0,
                grid=grid,
                in_specs=in_specs,
                out_specs=pl.BlockSpec((None, c_out, t_hw),
                                       lambda i, j: (i, 0, j)),
            ),
            compiler_params=pltpu.CompilerParams(
                dimension_semantics=("parallel", "parallel"),
                vmem_limit_bytes=int(min(40 << 20,
                                         max(vmem_est + (4 << 20), 32 << 20)))),
            cost_estimate=pl.CostEstimate(flops=flops, transcendentals=0,
                                          bytes_accessed=bytes_accessed),
        )(*args)
        return out3.reshape(n, c_out, h, w)

    # ----- Variant B: channels on lanes (deep stages) -----------------------
    t_co = c_out
    for cand in (512, 256, 128):
        if c_out > cand and c_out % cand == 0:
            t_co = cand
            break
    grid = (n, c_out // t_co)        # C_out axis feeds both v7x TCs even at n=1

    wt = wm.T                        # (C_in, C_out); tiny weight-side transpose
    in_specs = [
        pl.BlockSpec((None, c_in, hw), lambda i, c: (i, 0, 0)),
        pl.BlockSpec((c_in, t_co), lambda i, c: (0, c)),
        pl.BlockSpec((1, t_co), lambda i, c: (0, c)),
    ]
    args = [x3, wt, bias.reshape(1, c_out)]
    if has_res:
        in_specs.append(pl.BlockSpec((None, t_co, hw), lambda i, c: (i, c, 0)))
        args.append(res3)

    vmem_est = (2 * (c_in * hw * isz + c_in * t_co * isz + hw * t_co * osz
                     + (t_co * hw * isz if has_res else 0))
                + t_co * 128 * 4)
    out_cl = pl.pallas_call(
        functools.partial(_kernel_channel_lanes, relu=relu, has_res=has_res),
        out_shape=jax.ShapeDtypeStruct((n, hw, c_out), odt),
        grid_spec=pltpu.PrefetchScalarGridSpec(
            num_scalar_prefetch=0,
            grid=grid,
            in_specs=in_specs,
            out_specs=pl.BlockSpec((None, hw, t_co), lambda i, c: (i, 0, c)),
        ),
        compiler_params=pltpu.CompilerParams(
            dimension_semantics=("parallel", "parallel"),
            vmem_limit_bytes=int(min(40 << 20,
                                     max(vmem_est + (4 << 20), 32 << 20)))),
        cost_estimate=pl.CostEstimate(flops=flops, transcendentals=0,
                                      bytes_accessed=bytes_accessed),
    )(*args)
    # TODO(synk): in a fully fused deep-stage pipeline keep this NHWC layout for
    # the next op; here we transpose back to NCHW (deep-stage tensors are small)
    # to match the PyTorch module's layout.
    return out_cl.transpose(0, 2, 1).reshape(n, c_out, h, w)


# ---------------------------------------------------------------------------
# Self-test
# ---------------------------------------------------------------------------

if __name__ == "__main__":
    EPS = 1e-5
    root = jax.random.PRNGKey(0)
    keys = jax.random.split(root, 8)

    def bn_params(key, c):
        k1, k2, k3, k4 = jax.random.split(key, 4)
        gamma = jax.random.uniform(k1, (c,), minval=0.5, maxval=1.5)
        beta = jax.random.normal(k2, (c,)) * 0.1
        mean = jax.random.normal(k3, (c,)) * 0.1
        var = jax.random.uniform(k4, (c,), minval=0.5, maxval=1.5)
        return gamma, beta, mean, var

    def run_case(case_key, *, n, c_in, c_out, h, w, relu, with_res=False,
                 partial_indices=False, stride=1, compute_dtype=None,
                 tile_hw_cap=None, atol=2e-2, rtol=2e-2):
        kx, kw, kb, kr, kp = jax.random.split(case_key, 5)
        x = jax.random.normal(kx, (n, c_in, h, w), dtype=jnp.float32)
        w_conv = jax.random.normal(kw, (c_out, c_in), dtype=jnp.float32) / (c_in ** 0.5)
        gamma, beta, mean, var = bn_params(kb, c_out)

        h_o, w_o = -(-h // stride), -(-w // stride)

        identity, indices, residual = None, None, None
        if with_res:
            c_id = (3 * c_out) // 4 if partial_indices else c_out
            identity = jax.random.normal(kr, (n, c_id, h_o, w_o), dtype=jnp.float32)
            if partial_indices:
                indices = jax.random.permutation(kp, c_out)[:c_id]
            residual = index_add_identity(identity, indices, c_out)

        w_fold, b_fold = fold_batchnorm(w_conv, gamma, beta, mean, var, eps=EPS)
        out = conv1x1_bn_act(x, w_fold, b_fold, residual=residual, relu=relu,
                             stride=stride, compute_dtype=compute_dtype,
                             tile_hw_cap=tile_hw_cap)
        out = jax.block_until_ready(out)

        # Pure-JAX reference: conv1x1 -> BatchNorm -> index_add_(identity) -> ReLU.
        xs = x[:, :, ::stride, ::stride] if stride > 1 else x
        y = jnp.einsum("nchw,oc->nohw", xs, w_conv,
                       precision=lax.Precision.HIGHEST)
        scale = gamma / jnp.sqrt(var + EPS)
        y = y * scale[None, :, None, None] + (beta - mean * scale)[None, :, None, None]
        if identity is not None:
            if indices is None:
                y = y + identity
            else:
                y = y.at[:, indices, :, :].add(identity)
        if relu:
            y = jnp.maximum(y, 0.0)

        assert out.shape == y.shape, (out.shape, y.shape)
        err = float(jnp.max(jnp.abs(out.astype(jnp.float32) - y)))
        assert bool(jnp.allclose(out.astype(jnp.float32), y, atol=atol, rtol=rtol)), (
            f"mismatch (max abs err {err})")

    # 1) tiny baseline (spatial-on-lanes, lane-dense 16x16): conv + BN + ReLU
    run_case(keys[0], n=2, c_in=4, c_out=3, h=16, w=16, relu=True)
    # 2) deep-stage shape (channels-on-lanes, HW=49): conv + BN + index_add residual + ReLU
    run_case(keys[1], n=2, c_in=32, c_out=128, h=7, w=7, relu=True,
             with_res=True, partial_indices=True)
    # 3) ragged spatial tail / forced tiling (masked final block) on the spatial-lanes path
    run_case(keys[2], n=1, c_in=16, c_out=8, h=18, w=18, relu=False, tile_hw_cap=128)
    # 4) strided downsample conv1x1 + BN (no ReLU), as in the Bottleneck downsample path
    run_case(keys[3], n=1, c_in=8, c_out=16, h=8, w=8, relu=False, stride=2)
    # 5) bf16 compute (f32 accumulation) on the deep-stage path
    run_case(keys[4], n=2, c_in=32, c_out=128, h=7, w=7, relu=True,
             with_res=True, compute_dtype=jnp.bfloat16, atol=5e-2, rtol=5e-2)

    print("KERNEL_OK")
</pallas_src>

<mosaic_0001>
module attributes {stable_mosaic.version = 11 : i64} {
  func.func @_kernel_spatial_lanes(%arg0: i32, %arg1: i32, %arg2: memref<1x4x256xf32, #tpu.memory_space<vmem>>, %arg3: memref<3x4xf32, #tpu.memory_space<vmem>>, %arg4: memref<3x1xf32, #tpu.memory_space<vmem>>, %arg5: memref<1x3x256xf32, #tpu.memory_space<vmem>>) attributes {dimension_semantics = [#tpu.dimension_semantics<parallel>, #tpu.dimension_semantics<parallel>], iteration_bounds = array<i64: 2, 1>, scalar_prefetch = 0 : i64, scratch_operands = 0 : i64, tpu.core_type = #tpu.core_type<tc>, window_params = [{transform_indices = @transform_0, window_bounds = array<i64: 1, 4, 256>}, {pipeline_mode = #tpu.pipeline_mode<synchronous>, transform_indices = @transform_1, window_bounds = array<i64: 3, 4>}, {pipeline_mode = #tpu.pipeline_mode<synchronous>, transform_indices = @transform_2, window_bounds = array<i64: 3, 1>}, {transform_indices = @transform_3, window_bounds = array<i64: 1, 3, 256>}]} {
    %c0 = arith.constant 0 : index
    %c0_0 = arith.constant 0 : index
    %0 = vector.load %arg3[%c0, %c0_0] : memref<3x4xf32, #tpu.memory_space<vmem>>, vector<3x4xf32>
    %c0_1 = arith.constant 0 : index
    %c0_2 = arith.constant 0 : index
    %c0_3 = arith.constant 0 : index
    %1 = vector.load %arg2[%c0_1, %c0_2, %c0_3] : memref<1x4x256xf32, #tpu.memory_space<vmem>>, vector<1x4x256xf32>
    %2 = vector.shape_cast %1 : vector<1x4x256xf32> to vector<4x256xf32>
    %cst = arith.constant dense<0.000000e+00> : vector<3x256xf32>
    %3 = tpu.matmul %0, %2, %cst {dimension_numbers = #tpu.dot_dimension_numbers<[1], [0], [0], [1], [0, 0, 1, 1], [], []>} : vector<3x4xf32>, vector<4x256xf32>, vector<3x256xf32> -> vector<3x256xf32>
    %c0_4 = arith.constant 0 : index
    %c0_5 = arith.constant 0 : index
    %4 = vector.load %arg4[%c0_4, %c0_5] : memref<3x1xf32, #tpu.memory_space<vmem>>, vector<3x1xf32>
    %5 = vector.broadcast %4 : vector<3x1xf32> to vector<3x256xf32>
    %6 = arith.addf %3, %5 : vector<3x256xf32>
    %cst_6 = arith.constant 0.000000e+00 : f32
    %7 = vector.broadcast %cst_6 : f32 to vector<3x256xf32>
    %8 = arith.maximumf %6, %7 : vector<3x256xf32>
    %c0_7 = arith.constant 0 : index
    %c0_8 = arith.constant 0 : index
    %c0_9 = arith.constant 0 : index
    %9 = vector.load %arg5[%c0_7, %c0_8, %c0_9] : memref<1x3x256xf32, #tpu.memory_space<vmem>>, vector<1x3x256xf32>
    %10 = vector.shape_cast %9 : vector<1x3x256xf32> to vector<3x256xf32>
    %11 = vector.shape_cast %8 : vector<3x256xf32> to vector<1x3x256xf32>
    tpu.vector_store %arg5[%c0_7, %c0_8, %c0_9], %11 {strides = array<i32>} : memref<1x3x256xf32, #tpu.memory_space<vmem>>, vector<1x3x256xf32>,
    return
  }
  func.func @transform_0(%arg0: i32, %arg1: i32) -> (i32, i32, i32) {
    %c0_i32 = arith.constant 0 : i32
    %c0_i32_0 = arith.constant 0 : i32
    return %arg0, %c0_i32, %arg1 : i32, i32, i32
  }
  func.func @transform_1(%arg0: i32, %arg1: i32) -> (i32, i32) {
    %c0_i32 = arith.constant 0 : i32
    %c0_i32_0 = arith.constant 0 : i32
    %c0_i32_1 = arith.constant 0 : i32
    return %c0_i32, %c0_i32_0 : i32, i32
  }
  func.func @transform_2(%arg0: i32, %arg1: i32) -> (i32, i32) {
    %c0_i32 = arith.constant 0 : i32
    %c0_i32_0 = arith.constant 0 : i32
    %c0_i32_1 = arith.constant 0 : i32
    return %c0_i32, %c0_i32_0 : i32, i32
  }
  func.func @transform_3(%arg0: i32, %arg1: i32) -> (i32, i32, i32) {
    %c0_i32 = arith.constant 0 : i32
    %c0_i32_0 = arith.constant 0 : i32
    return %arg0, %c0_i32, %arg1 : i32, i32, i32
  }
}

</mosaic_0001>

<bundles_post_ra>
// kernel: conv1x1_bn_act.1
= control target key start
LH: loop header
LB: loop body
LE: loop exit
PB: predicated region body
PF: predicated region fallthrough
CT: control target
= control target key end

     0   :  { %s484_s12 = smov 0   ;;  %s486_s13 = smov 0   ;;  %s523_s0 = inlined_call_operand.vmem [shape: f32[2,4,256], index: 0, kind: input, shape index: {}]   ;;  %s524_s1 = inlined_call_operand.vmem [shape: f32[3,4], index: 1, kind: input, shape index: {}]   ;;  %s525_s2 = inlined_call_operand.vmem [shape: f32[3,1], index: 2, kind: input, shape index: {}]   ;;  %s526_s3 = inlined_call_operand.vmem [shape: f32[2,3,256], index: 3, kind: output, shape index: {}]  }
   0x1   :  { %s488_s14 = smov 0  }
   0x2 LB: > { %s25_s15 = sadd.s32 1, %s456_s13  ;;  %p398_p0 = scmp.ge.s32.totalorder %s460_s14, 1  ;;  %s460_s14 = sphi %s488_s14, %s13_s14   ;;  %s456_s13 = sphi %s486_s13, %s528_s13   ;;  %s452_s12 = sphi %s484_s12, %s527_s12  }
   0x3   : > { %p27_p1 = scmp.ge.s32.totalorder %s25_s15, 2  ;;  %p158_p2 = scmp.lt.s32.totalorder %s460_s14, 3 }
   0x5   : > { %s530_s15 = smov (%p27_p1, %s25_s15), 0  ;;  %p159_p3 = pnand %p398_p0, %p158_p2 }
   0x6   : > { %p191_p4 = scmp.lt.s32.totalorder (!%p159_p3), %s452_s12, 1 }
   0x7   : > { %162 = sbr.rel (%p159_p3) target bundleno = 222 (0xde), region = 32 }
   0xc   : > { %v462_v0 = vmov 0.0   ;;  %v212_v1 = vld [vmem:[%s525_s2] sm:$0x7]  ;;  %s532_s12 = smov (!%p191_p4, %s452_s12), 1  ;;  %v463_v2 = vmov 0   ;;  %vm224_vm0 = vcmask 1043456  }
   0xd   : > { %293 = vmatprep.mubr.f32.mxu0 %v462_v0  ;;  %436 = vset.pattern.permute.xlu0 %v463_v2  ;;  %s408_s18 = sshll.u32 %s532_s12, 3  ;;  %v210_v5 = vld [vmem:[%s524_s1] sm:$0x7]  ;;  %vm220_vm1 = vcmask 31744  }
   0xe   : > { %215 = vperm.xlu0 %436, %v212_v1   ;;  %s198_s21 = scalar_lea.vmem %s523_s0, %s408_s18  ;;  %s208_s26 = scalar_lea.vmem %s526_s3, %s408_s18 }
   0xf   : > { %v211_v3 = vld [vmem:[%s198_s21] sm:$0xff] }
  0x10   : > { %v219_v4 = vcombine.high %v211_v3, %v211_v3 }
  0x12   : > { %403 = vmatprep.subr.msk.mxu0 %vm224_vm0, %v219_v4 }
  0x13   : > { %404 = vmatpush1.msk.msra.mxu0 %vm224_vm0, %v211_v3 }
  0x14   : > { %405 = vmatmul.mubr.msk.f32.vlgmr.msra.gmra.mxu0 %vm220_vm1, %v210_v5 }
  0x89   : > { %v216_v6 = vpop.permute.xlu0 %215 }
  0xd4   : > { %v295_v7 = vpop.f32.mrf.mxu0 }
  0xd5   : > { %v296_v8 = vadd.f32 %v295_v7, %v216_v6 }
  0xd6   : > { %v297_v9 = vpop.f32.mrf.mxu0 }
  0xd7   : > { %v298_v10 = vadd.f32 %v297_v9, %v216_v6  ;;  %v300_v11 = vmax.f32 %v296_v8, 0.0 }
  0xd9   : > { %v301_v12 = vmax.f32 %v298_v10, 0.0 }
  0xdb   : > { %v304_v13 = vcombine.low %v300_v11, %v301_v12 }
  0xdd   : > { %306 = vst [vmem:[%s208_s26] sm:$0x77] %v304_v13 }
  0xde PF: > { %s13_s14 = sadd.s32 1, %s460_s14   ;;  %s527_s12 = smov %s456_s13 }
  0xdf   : > { %p10_p5 = scmp.ge.s32.totalorder %s13_s14, 4   ;;  %s528_s13 = smov %s530_s15 }
  0xe1   :  { %12 = sbr.rel (!%p10_p5) target bundleno = 2 (0x2), region = 62 }

</bundles_post_ra>
